<compile_context>
chip_gen: v6e
topology: v6e:2x2x1
jax: 0.10.0
libtpu: 0.0.40
codegen_flags: <defaults>
</compile_context>

<pallas_src>
import functools

import jax
import jax.numpy as jnp
from jax.experimental import pallas as pl
from jax.experimental.pallas import tpu as pltpu


def _round_up(x, m):
    return ((x + m - 1) // m) * m


def _cdiv(a, b):
    return (a + b - 1) // b


# ---------------------------------------------------------------------------
# Pallas kernel: fused (e0 [+ theta]) backbone-projection + 2-layer MLP head
# ---------------------------------------------------------------------------
def _heads_kernel(y_ref, tau_ref, wzy_ref, wzt_ref, bz_ref,
                  w1_ref, b1_ref, w2_ref, b2_ref, *out_refs, out_dim):
    y = y_ref[...]                                                    # (TM, F_pad) bf16

    # backbone stand-in: Linear([y, tau]) -> tanh.
    # tau enters as a rank-1 f32 term on the accumulator (no input concat needed).
    acc = jnp.dot(y, wzy_ref[...], preferred_element_type=jnp.float32)
    acc = acc + tau_ref[...] * wzt_ref[...] + bz_ref[...]
    z = jnp.tanh(acc).astype(y.dtype)     # tanh on f32 (EUP); bf16 only for MXU operand

    # head layer 1: Linear -> ReLU   (ReLU on the f32 accumulator)
    acc = jnp.dot(z, w1_ref[...], preferred_element_type=jnp.float32) + b1_ref[...]
    h = jnp.maximum(acc, 0.0).astype(y.dtype)

    # head layer 2: Linear -> split the fused [e0 | theta] columns into the outputs
    out = jnp.dot(h, w2_ref[...], preferred_element_type=jnp.float32) + b2_ref[...]
    out_refs[0][...] = out[:, :out_dim]                               # e0
    if len(out_refs) == 2:
        out_refs[1][...] = out[:, out_dim:]                           # theta


def _run_heads(y, tau_rows, fp, *, tile_m, using_theta, out_dim):
    """y: (M_pad, F_pad) bf16, tau_rows: (M_pad, 1) f32 -> e0 (and theta) (M_pad, out_dim) f32."""
    M_pad, f_pad = y.shape
    two_h = fp["wz_y"].shape[1]
    mid2 = fp["w1"].shape[1]
    w2_cols = fp["w2"].shape[1]
    assert M_pad % tile_m == 0

    row = lambda c: pl.BlockSpec((tile_m, c), lambda i: (i, 0))
    full = lambda r, c: pl.BlockSpec((r, c), lambda i: (0, 0))

    in_specs = [
        row(f_pad), row(1),
        full(f_pad, two_h), full(1, two_h), full(1, two_h),
        full(two_h, mid2), full(1, mid2),
        full(mid2, w2_cols), full(1, w2_cols),
    ]

    n_out = 2 if using_theta else 1
    out_shape = tuple(jax.ShapeDtypeStruct((M_pad, out_dim), jnp.float32) for _ in range(n_out))
    out_specs = tuple(row(out_dim) for _ in range(n_out))
    if n_out == 1:
        out_shape, out_specs = out_shape[0], out_specs[0]

    # Short, memory-bound custom call: tell XLA so it overlaps neighbours around it.
    flops = 2 * M_pad * (f_pad * two_h + two_h * mid2 + mid2 * w2_cols)
    bytes_accessed = (
        y.size * y.dtype.itemsize + tau_rows.size * 4
        + sum(int(v.size) * v.dtype.itemsize for v in fp.values())
        + n_out * M_pad * out_dim * 4
    )
    cost = pl.CostEstimate(flops=flops, transcendentals=M_pad * two_h,
                           bytes_accessed=bytes_accessed)

    return pl.pallas_call(
        functools.partial(_heads_kernel, out_dim=out_dim),
        out_shape=out_shape,
        grid=(M_pad // tile_m,),
        in_specs=in_specs,
        out_specs=out_specs,
        compiler_params=pltpu.CompilerParams(dimension_semantics=("parallel",)),
        cost_estimate=cost,
    )(y, tau_rows, fp["wz_y"], fp["wz_tau"], fp["bz"], fp["w1"], fp["b1"], fp["w2"], fp["b2"])


# ---------------------------------------------------------------------------
# Weight fusion — run ONCE at init, not per forward step
# ---------------------------------------------------------------------------
def prepare_fused_params(params, *, f_y, using_theta, compute_dtype=jnp.bfloat16):
    """Fuse e0 (+ theta) weights into single MXU-pass matrices.

    Block-diagonal fusion is kept only while the fused widths (2H, 2*mid) fit one
    MXU pass: <=128 on v5e, <=256 on v6e/v7x. At H = mid = 32 this holds on all
    generations; if the model grows past that, split into per-head matmuls.
    """
    hidden = params["wz_e0"].shape[1]
    mid = params["w1_e0"].shape[1]
    out_dim = params["w2_e0"].shape[1]
    f_pad = _round_up(f_y, 8)

    def split_wz(wz):
        # wz is (F+1, H): y-feature rows padded to 8-aligned K, tau row kept separate.
        wz_y = jnp.zeros((f_pad, wz.shape[1]), jnp.float32).at[:f_y].set(wz[:f_y])
        wz_tau = wz[f_y:f_y + 1]
        return wz_y, wz_tau

    if using_theta:
        wzy_e0, wzt_e0 = split_wz(params["wz_e0"])
        wzy_th, wzt_th = split_wz(params["wz_th"])
        wz_y = jnp.concatenate([wzy_e0, wzy_th], axis=1)                    # (F_pad, 2H)
        wz_tau = jnp.concatenate([wzt_e0, wzt_th], axis=1)                  # (1, 2H)
        bz = jnp.concatenate([params["bz_e0"], params["bz_th"]], axis=1)
        w1 = jnp.zeros((2 * hidden, 2 * mid), jnp.float32)                  # block-diag
        w1 = w1.at[:hidden, :mid].set(params["w1_e0"]).at[hidden:, mid:].set(params["w1_th"])
        b1 = jnp.concatenate([params["b1_e0"], params["b1_th"]], axis=1)
        w2 = jnp.zeros((2 * mid, 2 * out_dim), jnp.float32)                 # block-diag
        w2 = w2.at[:mid, :out_dim].set(params["w2_e0"]).at[mid:, out_dim:].set(params["w2_th"])
        b2 = jnp.concatenate([params["b2_e0"], params["b2_th"]], axis=1)
    else:
        # theta branch skipped entirely: only the e0 weights are fused in.
        wz_y, wz_tau = split_wz(params["wz_e0"])
        bz, w1, b1 = params["bz_e0"], params["w1_e0"], params["b1_e0"]
        w2, b2 = params["w2_e0"], params["b2_e0"]

    return dict(
        wz_y=wz_y.astype(compute_dtype), wz_tau=wz_tau.astype(jnp.float32),
        bz=bz.astype(jnp.float32),
        w1=w1.astype(compute_dtype), b1=b1.astype(jnp.float32),
        w2=w2.astype(compute_dtype), b2=b2.astype(jnp.float32),
    )


# ---------------------------------------------------------------------------
# Row-tile selection: large tiles, bounded padding waste, >=2 steps when big (v7x)
# ---------------------------------------------------------------------------
def _choose_tile_m(M, max_tile_m=2048):
    M8 = _round_up(M, 8)
    if M8 <= 1024:
        tile = M8                                         # whole problem, one grid step
    else:
        # big enough to matter: give the grid >=2 parallel steps (2 TCs on v7x),
        # capped at max_tile_m (per-step VMEM stays ~0.4 MB, far below scoped limits).
        tile = min(max_tile_m, _round_up(_cdiv(M8, 2), 8))
    # bound padding waste to <=12.5% of real rows
    while tile > 8 and (_round_up(M8, tile) - M8) * 8 > M8:
        tile = max(8, _round_up(tile // 2, 8))
    return tile, _round_up(M8, tile)


# ---------------------------------------------------------------------------
# Python wrapper reproducing AbstractTreatmentModule.forward
# ---------------------------------------------------------------------------
def treatment_module_forward(windows_batch, tau, fused_params, *, using_theta, training,
                             max_tile_m=2048):
    """Returns (e0, theta) with shapes (B, S, 2**treatment_max_value)."""
    del training  # training / torch.no_grad only affect gradient flow, not forward values

    y = windows_batch["insample_y"]                       # (B, S, F)
    B, S, F = y.shape
    M = B * S
    f_pad = fused_params["wz_y"].shape[0]
    out_dim = fused_params["b2"].shape[1] // (2 if using_theta else 1)

    tile_m, M_pad = _choose_tile_m(M, max_tile_m)

    # Single cast+pad pass for y; tau travels as a tiny (M_pad, 1) f32 column.
    y2 = jnp.pad(y.reshape(M, F).astype(jnp.bfloat16), ((0, M_pad - M), (0, f_pad - F)))
    tau_rows = jnp.broadcast_to(tau.reshape(B, 1, 1).astype(jnp.float32), (B, S, 1)).reshape(M, 1)
    tau_rows = jnp.pad(tau_rows, ((0, M_pad - M), (0, 0)))

    outs = _run_heads(y2, tau_rows, fused_params,
                      tile_m=tile_m, using_theta=using_theta, out_dim=out_dim)

    if using_theta:
        e0_flat, th_flat = outs
        e0 = e0_flat[:M].reshape(B, S, out_dim)           # encode_e0_values == identity
        theta = th_flat[:M].reshape(B, S, out_dim)
    else:
        e0 = outs[:M].reshape(B, S, out_dim)
        theta = jnp.ones_like(e0)
    return e0, theta


# ---------------------------------------------------------------------------
# Deterministic parameter construction + pure-JAX reference
# ---------------------------------------------------------------------------
def init_params(key, f_in, hidden_size, last_nn, treatment_max_value):
    out_dim = 2 ** treatment_max_value
    mid = last_nn[0]
    keys = jax.random.split(key, 12)

    def lin(kw, kb, fan_in, fan_out):
        lim = 1.0 / jnp.sqrt(jnp.float32(fan_in))
        w = jax.random.uniform(kw, (fan_in, fan_out), jnp.float32, -lim, lim)
        b = jax.random.uniform(kb, (1, fan_out), jnp.float32, -lim, lim)
        return w, b

    wz_e0, bz_e0 = lin(keys[0], keys[1], f_in, hidden_size)
    w1_e0, b1_e0 = lin(keys[2], keys[3], hidden_size, mid)
    w2_e0, b2_e0 = lin(keys[4], keys[5], mid, out_dim)
    wz_th, bz_th = lin(keys[6], keys[7], f_in, hidden_size)
    w1_th, b1_th = lin(keys[8], keys[9], hidden_size, mid)
    w2_th, b2_th = lin(keys[10], keys[11], mid, out_dim)
    return dict(
        wz_e0=wz_e0, bz_e0=bz_e0, w1_e0=w1_e0, b1_e0=b1_e0, w2_e0=w2_e0, b2_e0=b2_e0,
        wz_th=wz_th, bz_th=bz_th, w1_th=w1_th, b1_th=b1_th, w2_th=w2_th, b2_th=b2_th,
    )


def reference_forward(windows_batch, tau, params, *, using_theta):
    y = windows_batch["insample_y"]
    B, S, F = y.shape
    tau_feat = jnp.broadcast_to(tau.reshape(B, 1, 1).astype(jnp.float32), (B, S, 1))
    x = jnp.concatenate([y.astype(jnp.float32), tau_feat], axis=-1)

    def head(wz, bz, w1, b1, w2, b2):
        z = jnp.tanh(x @ wz + bz)
        h = jnp.maximum(z @ w1 + b1, 0.0)
        return h @ w2 + b2

    e0 = head(params["wz_e0"], params["bz_e0"], params["w1_e0"], params["b1_e0"],
              params["w2_e0"], params["b2_e0"])
    if using_theta:
        theta = head(params["wz_th"], params["bz_th"], params["w1_th"], params["b1_th"],
                     params["w2_th"], params["b2_th"])
    else:
        theta = jnp.ones_like(e0)
    return e0, theta


if __name__ == "__main__":
    # Small, forward-consistent shapes
    B, S, F = 2, 8, 7            # batch, sequence length, raw window features
    hidden_size = 32             # TFT hidden size (backbone z dim)
    last_nn = [32]               # hidden widths of the sequential head
    treatment_max_value = 3      # head output dim = 2**3 = 8
    out_dim = 2 ** treatment_max_value

    key = jax.random.PRNGKey(0)
    k_y, k_tau, k_params = jax.random.split(key, 3)

    windows_batch = {"insample_y": jax.random.normal(k_y, (B, S, F), jnp.float32)}
    tau = jax.random.uniform(k_tau, (B, 1), jnp.float32)
    params = init_params(k_params, F + 1, hidden_size, last_nn, treatment_max_value)

    # Weight fusion hoisted out of the per-step hot path (done once per config).
    fp_e0 = prepare_fused_params(params, f_y=F, using_theta=False)
    fp_both = prepare_fused_params(params, f_y=F, using_theta=True)

    fwd = jax.jit(functools.partial(treatment_module_forward, using_theta=False, training=True))
    e0, theta = fwd(windows_batch, tau, fp_e0)
    jax.block_until_ready((e0, theta))

    fwd_theta = jax.jit(functools.partial(treatment_module_forward, using_theta=True, training=False))
    e0_t, theta_t = fwd_theta(windows_batch, tau, fp_both)
    jax.block_until_ready((e0_t, theta_t))

    # shape / branch checks
    assert e0.shape == (B, S, out_dim)
    assert theta.shape == e0.shape
    assert e0_t.shape == e0.shape and theta_t.shape == e0.shape
    assert bool(jnp.all(theta == 1.0))          # using_theta=False -> ones_like(e0)
    assert not bool(jnp.all(theta_t == 1.0))    # using_theta=True  -> theta head output
    assert bool(jnp.all(jnp.isfinite(e0))) and bool(jnp.all(jnp.isfinite(theta_t)))

    # numeric check against the pure-f32 reference (bf16 MXU operands -> loose tol)
    e0_ref, _ = reference_forward(windows_batch, tau, params, using_theta=False)
    e0t_ref, th_ref = reference_forward(windows_batch, tau, params, using_theta=True)
    assert bool(jnp.allclose(e0, e0_ref, atol=5e-2, rtol=5e-2))
    assert bool(jnp.allclose(e0_t, e0t_ref, atol=5e-2, rtol=5e-2))
    assert bool(jnp.allclose(theta_t, th_ref, atol=5e-2, rtol=5e-2))
    # e0 path is identical whether or not theta is fused in (zero blocks add exactly 0)
    assert bool(jnp.allclose(e0, e0_t, atol=1e-3, rtol=1e-3))

    print("KERNEL_OK")
</pallas_src>

<mosaic_0001>
module attributes {stable_mosaic.version = 11 : i64} {
  func.func @_heads_kernel(%arg0: i32, %arg1: memref<16x8xbf16, #tpu.memory_space<vmem>>, %arg2: memref<16x1xf32, #tpu.memory_space<vmem>>, %arg3: memref<8x32xbf16, #tpu.memory_space<vmem>>, %arg4: memref<1x32xf32, #tpu.memory_space<vmem>>, %arg5: memref<1x32xf32, #tpu.memory_space<vmem>>, %arg6: memref<32x32xbf16, #tpu.memory_space<vmem>>, %arg7: memref<1x32xf32, #tpu.memory_space<vmem>>, %arg8: memref<32x8xbf16, #tpu.memory_space<vmem>>, %arg9: memref<1x8xf32, #tpu.memory_space<vmem>>, %arg10: memref<16x8xf32, #tpu.memory_space<vmem>>) attributes {dimension_semantics = [#tpu.dimension_semantics<parallel>], iteration_bounds = array<i64: 1>, scalar_prefetch = 0 : i64, scratch_operands = 0 : i64, tpu.core_type = #tpu.core_type<tc>, window_params = [{transform_indices = @transform_0, window_bounds = array<i64: 16, 8>}, {transform_indices = @transform_1, window_bounds = array<i64: 16, 1>}, {pipeline_mode = #tpu.pipeline_mode<synchronous>, transform_indices = @transform_2, window_bounds = array<i64: 8, 32>}, {pipeline_mode = #tpu.pipeline_mode<synchronous>, transform_indices = @transform_3, window_bounds = array<i64: 1, 32>}, {pipeline_mode = #tpu.pipeline_mode<synchronous>, transform_indices = @transform_4, window_bounds = array<i64: 1, 32>}, {pipeline_mode = #tpu.pipeline_mode<synchronous>, transform_indices = @transform_5, window_bounds = array<i64: 32, 32>}, {pipeline_mode = #tpu.pipeline_mode<synchronous>, transform_indices = @transform_6, window_bounds = array<i64: 1, 32>}, {pipeline_mode = #tpu.pipeline_mode<synchronous>, transform_indices = @transform_7, window_bounds = array<i64: 32, 8>}, {pipeline_mode = #tpu.pipeline_mode<synchronous>, transform_indices = @transform_8, window_bounds = array<i64: 1, 8>}, {transform_indices = @transform_9, window_bounds = array<i64: 16, 8>}]} {
    %c0 = arith.constant 0 : index
    %c0_0 = arith.constant 0 : index
    %0 = vector.load %arg1[%c0, %c0_0] : memref<16x8xbf16, #tpu.memory_space<vmem>>, vector<16x8xbf16>
    %c0_1 = arith.constant 0 : index
    %c0_2 = arith.constant 0 : index
    %1 = vector.load %arg3[%c0_1, %c0_2] : memref<8x32xbf16, #tpu.memory_space<vmem>>, vector<8x32xbf16>
    %cst = arith.constant dense<0.000000e+00> : vector<16x32xf32>
    %2 = tpu.matmul %0, %1, %cst {dimension_numbers = #tpu.dot_dimension_numbers<[1], [0], [0], [1], [0, 0, 1, 1], [], []>} : vector<16x8xbf16>, vector<8x32xbf16>, vector<16x32xf32> -> vector<16x32xf32>
    %c0_3 = arith.constant 0 : index
    %c0_4 = arith.constant 0 : index
    %3 = vector.load %arg2[%c0_3, %c0_4] : memref<16x1xf32, #tpu.memory_space<vmem>>, vector<16x1xf32>
    %c0_5 = arith.constant 0 : index
    %c0_6 = arith.constant 0 : index
    %4 = vector.load %arg4[%c0_5, %c0_6] : memref<1x32xf32, #tpu.memory_space<vmem>>, vector<1x32xf32>
    %5 = vector.broadcast %3 : vector<16x1xf32> to vector<16x32xf32>
    %6 = vector.broadcast %4 : vector<1x32xf32> to vector<16x32xf32>
    %7 = arith.mulf %5, %6 : vector<16x32xf32>
    %8 = arith.addf %2, %7 : vector<16x32xf32>
    %c0_7 = arith.constant 0 : index
    %c0_8 = arith.constant 0 : index
    %9 = vector.load %arg5[%c0_7, %c0_8] : memref<1x32xf32, #tpu.memory_space<vmem>>, vector<1x32xf32>
    %10 = vector.broadcast %9 : vector<1x32xf32> to vector<16x32xf32>
    %11 = arith.addf %8, %10 : vector<16x32xf32>
    %12 = math.tanh %11 : vector<16x32xf32>
    %13 = arith.truncf %12 : vector<16x32xf32> to vector<16x32xbf16>
    %c0_9 = arith.constant 0 : index
    %c0_10 = arith.constant 0 : index
    %14 = vector.load %arg6[%c0_9, %c0_10] : memref<32x32xbf16, #tpu.memory_space<vmem>>, vector<32x32xbf16>
    %cst_11 = arith.constant dense<0.000000e+00> : vector<16x32xf32>
    %15 = tpu.matmul %13, %14, %cst_11 {dimension_numbers = #tpu.dot_dimension_numbers<[1], [0], [0], [1], [0, 0, 1, 1], [], []>} : vector<16x32xbf16>, vector<32x32xbf16>, vector<16x32xf32> -> vector<16x32xf32>
    %c0_12 = arith.constant 0 : index
    %c0_13 = arith.constant 0 : index
    %16 = vector.load %arg7[%c0_12, %c0_13] : memref<1x32xf32, #tpu.memory_space<vmem>>, vector<1x32xf32>
    %17 = vector.broadcast %16 : vector<1x32xf32> to vector<16x32xf32>
    %18 = arith.addf %15, %17 : vector<16x32xf32>
    %cst_14 = arith.constant 0.000000e+00 : f32
    %19 = vector.broadcast %cst_14 : f32 to vector<16x32xf32>
    %20 = arith.maximumf %18, %19 : vector<16x32xf32>
    %21 = arith.truncf %20 : vector<16x32xf32> to vector<16x32xbf16>
    %c0_15 = arith.constant 0 : index
    %c0_16 = arith.constant 0 : index
    %22 = vector.load %arg8[%c0_15, %c0_16] : memref<32x8xbf16, #tpu.memory_space<vmem>>, vector<32x8xbf16>
    %cst_17 = arith.constant dense<0.000000e+00> : vector<16x8xf32>
    %23 = tpu.matmul %21, %22, %cst_17 {dimension_numbers = #tpu.dot_dimension_numbers<[1], [0], [0], [1], [0, 0, 1, 1], [], []>} : vector<16x32xbf16>, vector<32x8xbf16>, vector<16x8xf32> -> vector<16x8xf32>
    %c0_18 = arith.constant 0 : index
    %c0_19 = arith.constant 0 : index
    %24 = vector.load %arg9[%c0_18, %c0_19] : memref<1x8xf32, #tpu.memory_space<vmem>>, vector<1x8xf32>
    %25 = vector.broadcast %24 : vector<1x8xf32> to vector<16x8xf32>
    %26 = arith.addf %23, %25 : vector<16x8xf32>
    %c0_20 = arith.constant 0 : index
    %c0_21 = arith.constant 0 : index
    %27 = vector.load %arg10[%c0_20, %c0_21] : memref<16x8xf32, #tpu.memory_space<vmem>>, vector<16x8xf32>
    tpu.vector_store %arg10[%c0_20, %c0_21], %26 {strides = array<i32>} : memref<16x8xf32, #tpu.memory_space<vmem>>, vector<16x8xf32>,
    return
  }
  func.func @transform_0(%arg0: i32) -> (i32, i32) {
    %c0_i32 = arith.constant 0 : i32
    %c0_i32_0 = arith.constant 0 : i32
    return %arg0, %c0_i32 : i32, i32
  }
  func.func @transform_1(%arg0: i32) -> (i32, i32) {
    %c0_i32 = arith.constant 0 : i32
    %c0_i32_0 = arith.constant 0 : i32
    return %arg0, %c0_i32 : i32, i32
  }
  func.func @transform_2(%arg0: i32) -> (i32, i32) {
    %c0_i32 = arith.constant 0 : i32
    %c0_i32_0 = arith.constant 0 : i32
    %c0_i32_1 = arith.constant 0 : i32
    return %c0_i32, %c0_i32_0 : i32, i32
  }
  func.func @transform_3(%arg0: i32) -> (i32, i32) {
    %c0_i32 = arith.constant 0 : i32
    %c0_i32_0 = arith.constant 0 : i32
    %c0_i32_1 = arith.constant 0 : i32
    return %c0_i32, %c0_i32_0 : i32, i32
  }
  func.func @transform_4(%arg0: i32) -> (i32, i32) {
    %c0_i32 = arith.constant 0 : i32
    %c0_i32_0 = arith.constant 0 : i32
    %c0_i32_1 = arith.constant 0 : i32
    return %c0_i32, %c0_i32_0 : i32, i32
  }
  func.func @transform_5(%arg0: i32) -> (i32, i32) {
    %c0_i32 = arith.constant 0 : i32
    %c0_i32_0 = arith.constant 0 : i32
    %c0_i32_1 = arith.constant 0 : i32
    return %c0_i32, %c0_i32_0 : i32, i32
  }
  func.func @transform_6(%arg0: i32) -> (i32, i32) {
    %c0_i32 = arith.constant 0 : i32
    %c0_i32_0 = arith.constant 0 : i32
    %c0_i32_1 = arith.constant 0 : i32
    return %c0_i32, %c0_i32_0 : i32, i32
  }
  func.func @transform_7(%arg0: i32) -> (i32, i32) {
    %c0_i32 = arith.constant 0 : i32
    %c0_i32_0 = arith.constant 0 : i32
    %c0_i32_1 = arith.constant 0 : i32
    return %c0_i32, %c0_i32_0 : i32, i32
  }
  func.func @transform_8(%arg0: i32) -> (i32, i32) {
    %c0_i32 = arith.constant 0 : i32
    %c0_i32_0 = arith.constant 0 : i32
    %c0_i32_1 = arith.constant 0 : i32
    return %c0_i32, %c0_i32_0 : i32, i32
  }
  func.func @transform_9(%arg0: i32) -> (i32, i32) {
    %c0_i32 = arith.constant 0 : i32
    %c0_i32_0 = arith.constant 0 : i32
    return %arg0, %c0_i32 : i32, i32
  }
}

</mosaic_0001>

<bundles_post_ra>
// kernel: treatment_module_forward.1
= control target key start
LH: loop header
LB: loop body
LE: loop exit
PB: predicated region body
PF: predicated region fallthrough
CT: control target
= control target key end

     0   :  { %vm67_vm0 = vcmask 1043456   ;;  %v360_v1 = vmov 0.0   ;;  %vm361_vm1 = vmmov 0   ;;  %vm63_vm2 = vcmask 64512   ;;  %s460_s0 = inlined_call_operand.vmem [shape: bf16[16,8], index: 0, kind: input, shape index: {}]   ;;  %s461_s1 = inlined_call_operand.vmem [shape: f32[16,1], index: 1, kind: input, shape index: {}]   ;;  %s462_s2 = inlined_call_operand.vmem [shape: bf16[8,32], index: 2, kind: input, shape index: {}]   ;;  %s463_s3 = inlined_call_operand.vmem [shape: f32[1,32], index: 3, kind: input, shape index: {}]   ;;  %s464_s4 = inlined_call_operand.vmem [shape: f32[1,32], index: 4, kind: input, shape index: {}]   ;;  %s465_s5 = inlined_call_operand.vmem [shape: bf16[32,32], index: 5, kind: input, shape index: {}]   ;;  %s466_s6 = inlined_call_operand.vmem [shape: f32[1,32], index: 6, kind: input, shape index: {}]   ;;  %s467_s7 = inlined_call_operand.vmem [shape: bf16[32,8], index: 7, kind: input, shape index: {}]   ;;  %s468_s8 = inlined_call_operand.vmem [shape: f32[1,8], index: 8, kind: input, shape index: {}]   ;;  %s469_s9 = inlined_call_operand.hbm [shape: f32[16,8], index: 9, kind: output, shape index: {}]  }
   0x1   :  { %v36_v0 = vld [vmem:[%s462_s2] sm:$0xf]  ;;  %300 = vmatprep.subr.bf16.mxu0 %v360_v1  ;;  %302 = vmatprep.mubr.msk.bf16.mxu0 %vm361_vm1, %v360_v1  ;;  %v362_v5 = vmov 0   ;;  %v38_v6 = vld [vmem:[%s461_s1 + $0x8] sm:$0xff] }
   0x2   :  { %v69_v2 = vsel %vm67_vm0, %v36_v0, 0  ;;  %v329_v3 = vld [vmem:[%s460_s0] sm:$0xff]   ;;  %306 = vmatprep.subr.bf16.mxu1 %v360_v1  ;;  %328 = vset.pattern.permute.xlu0 %v362_v5 }
   0x3   :  { %301 = vmatpush3.bf16.msra.mxu0 %v69_v2  ;;  %v37_v4 = vld [vmem:[%s461_s1] sm:$0xff]  ;;  %310 = vmatprep.mubr.msk.bf16.mxu1 %vm361_vm1, %v360_v1 }
   0x4   :  { %42 = vperm.xlu0 %328, %v37_v4   ;;  %314 = vmatprep.subr.bf16.mxu0 %v360_v1 }
   0x6   :  { %303 = vmatmul.mubr.msk.bf16.vlgmr.msra.gmra.mxu0 %vm63_vm2, %v329_v3 }
   0x7   :  { %14 = vsyncpa [#allocation3], 0  ;;  %318 = vmatprep.mubr.msk.bf16.mxu0 %vm361_vm1, %v360_v1  ;;  %v330_v7 = vld [vmem:[%s465_s5 + $0x8] sm:$0xff]   ;;  %v331_v8 = vld [vmem:[%s465_s5] sm:$0xff]   ;;  %vm147_vm3 = vcmask 261120  }
   0x8   :  { %47 = vperm.xlu0 %328, %v38_v6   ;;  %307 = vmatpush3.bf16.msra.mxu1 %v330_v7  ;;  %v280_v9 = vld [vmem:[%s463_s3] ss:$0 sm:$0xff]  ;;  %v332_v26 = vld [vmem:[%s467_s7 + $0x8] sm:$0xff]  }
   0x9   :  { %308 = vmatprep.subr.bf16.mxu1 %v360_v1  ;;  %v283_v15 = vld [vmem:[%s464_s4] ss:$0 sm:$0xff]  ;;  %315 = vmatpush3.bf16.msra.mxu0 %v332_v26 }
   0xa   :  { %316 = vmatprep.subr.bf16.mxu0 %v360_v1  ;;  %v333_v27 = vld [vmem:[%s467_s7] sm:$0xff]   ;;  %s363_s7 = smov [#allocation2]  }
   0xb   :  { %v284_v28 = vld [vmem:[%s466_s6] ss:$0 sm:$0xff]  ;;  %s269_s27 = sshll.u32 %s363_s7, 4  ;;  %s270_s27 = int_to_ptr.vmem [resolvable:$true] %s269_s27 }
   0xc   :  { %309 = vmatpush3.bf16.msra.mxu1 %v331_v8  ;;  %v288_v38 = vld [vmem:[%s468_s8] ss:$0 sm:$0xff]  ;;  %s338_s6 = scalar_lea.vmem %s270_s27, 256  ;;  %p343_p1 = scmp.lt.s32.totalorder %s270_s27, %s270_s27 }
   0xd   :  { %317 = vmatpush3.bf16.msra.mxu0 %v333_v27  ;;  %p339_p0 = scmp.ne.s32.totalorder %s270_s27, %s338_s6  ;;  %p344_p2 = scmp.lt.s32.totalorder %s338_s6, %s338_s6 }
   0xf   :  { %p345_p3 = por %p344_p2, %p343_p1 }
  0x11   :  { %p346_p4 = pnand %p345_p3, %p339_p0 }
  0x7f   :  { %v43_v10 = vpop.permute.xlu0 %42 }
  0x80   :  { %v56_v11 = vmul.f32 %v280_v9, %v43_v10 }
  0x83   :  { %v48_v12 = vpop.permute.xlu0 %47 }
  0x84   :  { %v57_v17 = vmul.f32 %v280_v9, %v48_v12 }
  0xc6   :  { %v105_v13 = vpop.f32.mrf.mxu0 }
  0xc7   :  { %v106_v14 = vadd.f32 %v105_v13, %v56_v11 }
  0xc8   :  { %v304_v16 = vpop.f32.mrf.mxu0 }
  0xc9   :  { %v119_v18 = vadd.f32 %v283_v15, %v106_v14 }
  0xca   :  { %v108_v19 = vpop.f32.mrf.mxu0 }
  0xcb   :  { %v109_v20 = vadd.f32 %v108_v19, %v57_v17  ;;  %334 = vtanh.f32 %v119_v18 }
  0xcc   :  { %v305_v21 = vpop.f32.mrf.mxu0 }
  0xcd   :  { %v120_v22 = vadd.f32 %v283_v15, %v109_v20 }
  0xcf   :  { %336 = vtanh.f32 %v120_v22 }
  0xd8   :  { %v335_v23 = vpop.eup %334 }
  0xdc   :  { %v337_v24 = vpop.eup %336 }
  0xdd   :  { %v123_v25 = vpack.c.bf16 %v337_v24, %v335_v23 }
  0xdf   :  { %311 = vmatmul.mubr.msk.bf16.vlgmr.msra.gmra.mxu1 %vm147_vm3, %v123_v25 }
 0x19f   :  { %v185_v29 = vpop.f32.mrf.mxu1 }
 0x1a0   :  { %v186_v31 = vadd.f32 %v284_v28, %v185_v29 }
 0x1a1   :  { %v312_v30 = vpop.f32.mrf.mxu1 }
 0x1a2   :  { %v192_v35 = vmax.f32 %v186_v31, 0.0 }
 0x1a3   :  { %v188_v32 = vpop.f32.mrf.mxu1 }
 0x1a4   :  { %v189_v33 = vadd.f32 %v284_v28, %v188_v32 }
 0x1a5   :  { %v313_v34 = vpop.f32.mrf.mxu1 }
 0x1a6   :  { %v193_v36 = vmax.f32 %v189_v33, 0.0 }
 0x1a8   :  { %v194_v37 = vpack.c.bf16 %v193_v36, %v192_v35 }
 0x1aa   :  { %319 = vmatmul.mubr.msk.bf16.vlgmr.msra.gmra.mxu0 %vm147_vm3, %v194_v37 }
 0x26a   :  { %v255_v39 = vpop.f32.mrf.mxu0 }
 0x26b   :  { %v256_v40 = vadd.f32 %v288_v38, %v255_v39 }
 0x26c   :  { %v320_v41 = vpop.f32.mrf.mxu0 }
 0x26d   :  { %262 = vst.msk [vmem:[#allocation2] sm:$0xff] %vm63_vm2, %v256_v40 }
 0x26e   :  { %v258_v42 = vpop.f32.mrf.mxu0 }
 0x26f   :  { %v259_v43 = vadd.f32 %v288_v38, %v258_v42 }
 0x270   :  { %v321_v44 = vpop.f32.mrf.mxu0 }
 0x271   :  { %263 = vst.msk [vmem:[#allocation2 + $0x8] sm:$0xff] %vm63_vm2, %v259_v43 }
 0x272   :  { %349 = shalt.err (!%p346_p4)
}
 0x273   :  { %s364_s8 = smov 128   ;;  %s365_s28 = smov 8  }
 0x274   :  { %275 = dma.vmem_to_hbm [thread:$0]  %s270_s27, 256, %s469_s9, [#allocation3], %s364_s8, %s364_s8, %s365_s28  }
 0x275   :  { %358 = dma.done.wait [#allocation3], 256  }
 0x276   :  { %359 = vsyncadd [#allocation3], 4294967040 }
 0x277   :  { %279 = vsyncpa [#allocation3], 1 }

</bundles_post_ra>
